<compile_context>
chip_gen: v7x
topology: tpu7x:2x2x1
jax: 0.10.0
libtpu: 0.0.40
codegen_flags: <defaults>
</compile_context>

<pallas_src>
import jax
import jax.numpy as jnp
from jax.experimental import pallas as pl
from jax.experimental.pallas import tpu as pltpu


def _round_up(x, m):
    return (x + m - 1) // m * m


def _choose_tiles(n, c, itemsize):
    # Class tile: whole (128-rounded) class axis when small, else 2048 lanes so
    # VMEM use is decoupled from the vocab size.
    tile_c = min(_round_up(c, 128), 2048)
    # Batch tile: per-buffer logits block <= 8 MiB (double-buffered -> 16 MiB,
    # safe inside v7x's 32 MiB scoped VMEM; raise on v5e/v6e for a few % more).
    budget = 8 * 1024 * 1024
    tile_n = (budget // (tile_c * itemsize)) // 8 * 8
    tile_n = max(8, min(1024, tile_n))
    # v7x has 2 TensorCores: make sure the "parallel" batch axis has >= 2 tiles.
    if n >= 16:
        tile_n = min(tile_n, _round_up(pl.cdiv(n, 2), 8))
    tile_n = min(tile_n, _round_up(n, 8))
    return tile_n, tile_c


def _make_kernel(tile_n, tile_c, num_classes, needs_mask):
    n_groups = tile_c // 128

    def kernel(logits_ref, labels_ref, loss_ref, m_ref, l_ref, p_ref, rel_ref):
        k = pl.program_id(1)
        last_k = pl.num_programs(1) - 1
        in_dtype = logits_ref.dtype
        fill = float(jnp.finfo(in_dtype).min)   # dtype-aware, finite (no NaN path)

        @pl.when(k == 0)
        def _():
            m_ref[...] = jnp.full_like(m_ref, jnp.finfo(jnp.float32).min)
            l_ref[...] = jnp.zeros_like(l_ref)
            p_ref[...] = jnp.zeros_like(p_ref)
            lane = jax.lax.broadcasted_iota(jnp.int32, (tile_n, 128), 1)
            # rel[n, j] = label[n] - j ; label hits global column base+g*128+j
            # iff rel[n, j] == base + g*128 (a scalar compare per lane group).
            rel_ref[...] = labels_ref[...] - lane

        def update(apply_mask):
            base = k * tile_c
            rel = rel_ref[...]
            if apply_mask:
                lane = jax.lax.broadcasted_iota(jnp.int32, (tile_n, 128), 1)

            # ---- Pass A (input dtype): per-lane tile max + picked-logit one-hot.
            tmax = jnp.full((tile_n, 128), fill, in_dtype)
            pick = jnp.zeros((tile_n, 128), in_dtype)
            for g in range(n_groups):
                xg = logits_ref[:, pl.ds(g * 128, 128)]
                if apply_mask:
                    xg = jnp.where(lane < (num_classes - base - g * 128), xg, fill)
                tmax = jnp.maximum(tmax, xg)
                pick = pick + jnp.where(rel == base + g * 128, xg, 0)
            p_ref[...] = p_ref[...] + pick.astype(jnp.float32)

            # ---- Online per-lane rescale (f32).
            m_prev = m_ref[...]
            m_new = jnp.maximum(m_prev, tmax.astype(jnp.float32))
            l_acc = l_ref[...] * jnp.exp(m_prev - m_new)

            # ---- Pass B (f32): per-lane sum of exp, upcast one lane group at a time.
            for g in range(n_groups):
                xg = logits_ref[:, pl.ds(g * 128, 128)].astype(jnp.float32)
                e = jnp.exp(xg - m_new)
                if apply_mask:
                    e = jnp.where(lane < (num_classes - base - g * 128), e, 0.0)
                l_acc = l_acc + e
            l_ref[...] = l_acc
            m_ref[...] = m_new

        if needs_mask:
            # Masking cost is paid only on the last (ragged) class tile.
            @pl.when(k != last_k)
            def _():
                update(False)

            @pl.when(k == last_k)
            def _():
                update(True)
        else:
            update(False)

        @pl.when(k == last_k)
        def _():
            # Single cross-lane combine of the 128 lane-partial (m, l) pairs.
            m = m_ref[...]
            l = l_ref[...]
            row_max = jnp.max(m, axis=-1, keepdims=True)
            ssum = jnp.sum(l * jnp.exp(m - row_max), axis=-1, keepdims=True)
            lse = row_max + jnp.log(ssum)
            picked = jnp.sum(p_ref[...], axis=-1, keepdims=True)  # at most 1 nonzero/row
            loss_ref[...] = lse - picked

    return kernel


def cross_entropy_loss(logits, labels, *, ignore_index=-100,
                       tile_n=None, tile_c=None,
                       vmem_limit_bytes=32 * 1024 * 1024):
    """Mean cross-entropy (nn.CrossEntropyLoss defaults) for logits (N, C) and
    integer targets (N,). logits may be float32 or bfloat16; math is f32."""
    n, c = logits.shape
    auto_n, auto_c = _choose_tiles(n, c, jnp.dtype(logits.dtype).itemsize)
    tile_n = auto_n if tile_n is None else tile_n
    tile_c = auto_c if tile_c is None else tile_c
    assert tile_n % 8 == 0 and tile_c % 128 == 0

    labels_i32 = labels.astype(jnp.int32)
    labels2d = labels_i32.reshape(n, 1)

    grid = (pl.cdiv(n, tile_n), pl.cdiv(c, tile_c))
    needs_mask = (c % tile_c) != 0

    per_row = pl.pallas_call(
        _make_kernel(tile_n, tile_c, c, needs_mask),
        out_shape=jax.ShapeDtypeStruct((n, 1), jnp.float32),
        grid_spec=pltpu.PrefetchScalarGridSpec(
            num_scalar_prefetch=0,
            grid=grid,
            in_specs=[
                pl.BlockSpec((tile_n, tile_c), lambda i, k: (i, k)),   # logits tile
                pl.BlockSpec((tile_n, 1), lambda i, k: (i, 0)),        # labels tile
            ],
            out_specs=pl.BlockSpec((tile_n, 1), lambda i, k: (i, 0)),  # per-row loss
            scratch_shapes=[
                pltpu.VMEM((tile_n, 128), jnp.float32),   # lane-partial running max
                pltpu.VMEM((tile_n, 128), jnp.float32),   # lane-partial sum-exp
                pltpu.VMEM((tile_n, 128), jnp.float32),   # lane-partial picked logit
                pltpu.VMEM((tile_n, 128), jnp.int32),     # cached (label - lane)
            ],
        ),
        compiler_params=pltpu.CompilerParams(
            # batch tiles independent (2-TC split on v7x); class axis = reduction
            dimension_semantics=("parallel", "arbitrary"),
            vmem_limit_bytes=vmem_limit_bytes,
        ),
    )(logits, labels2d)

    per_row = per_row[:, 0]
    valid = labels_i32 != ignore_index
    count = jnp.sum(valid).astype(jnp.float32)
    # Matches torch 'mean' reduction exactly: NaN (0/0) when every target is ignored.
    return jnp.sum(jnp.where(valid, per_row, 0.0)) / count


if __name__ == "__main__":
    key = jax.random.PRNGKey(0)
    k1, k2, k3, k4 = jax.random.split(key, 4)

    def ref_loss(logits, labels, ignore_index=-100):
        lg = logits.astype(jnp.float32)
        lse = jax.nn.logsumexp(lg, axis=-1)
        picked = jnp.take_along_axis(lg, jnp.maximum(labels, 0)[:, None], axis=-1)[:, 0]
        valid = labels != ignore_index
        return jnp.sum(jnp.where(valid, lse - picked, 0.0)) / jnp.sum(valid)

    # Case 1: f32, single class tile with ragged tail columns, one ignored target.
    N, C = 8, 32
    logits = jax.random.normal(k1, (N, C), dtype=jnp.float32)
    labels = jax.random.randint(k2, (N,), 0, C, dtype=jnp.int32).at[3].set(-100)
    out = cross_entropy_loss(logits, labels)
    jax.block_until_ready(out)
    assert jnp.allclose(out, ref_loss(logits, labels), atol=1e-5, rtol=1e-5), \
        (out, ref_loss(logits, labels))

    # Case 2: bf16, multiple tiles on both axes (both ragged), 2 lane groups,
    #         label on the last valid column, plus an ignored target.
    N, C = 20, 300
    logits = (jax.random.normal(k3, (N, C), dtype=jnp.float32) * 3.0).astype(jnp.bfloat16)
    labels = jax.random.randint(k4, (N,), 0, C, dtype=jnp.int32)
    labels = labels.at[0].set(C - 1).at[5].set(-100)
    out = cross_entropy_loss(logits, labels, tile_n=8, tile_c=256)
    jax.block_until_ready(out)
    assert jnp.allclose(out, ref_loss(logits, labels), atol=1e-4, rtol=1e-4), \
        (out, ref_loss(logits, labels))

    # Case 3: f32, class count a multiple of the class tile (no-masking code path),
    #         batch split into two tiles (v7x dual-core friendly).
    N, C = 16, 256
    logits = jax.random.normal(k1, (N, C), dtype=jnp.float32)
    labels = jax.random.randint(k2, (N,), 0, C, dtype=jnp.int32)
    out = cross_entropy_loss(logits, labels)
    jax.block_until_ready(out)
    assert jnp.allclose(out, ref_loss(logits, labels), atol=1e-5, rtol=1e-5), \
        (out, ref_loss(logits, labels))

    print("KERNEL_OK")
</pallas_src>

<mosaic_0001>
module attributes {stable_mosaic.version = 11 : i64} {
  func.func @kernel(%arg0: i32, %arg1: i32, %arg2: memref<8x128xf32, #tpu.memory_space<vmem>>, %arg3: memref<8x1xi32, #tpu.memory_space<vmem>>, %arg4: memref<8x1xf32, #tpu.memory_space<vmem>>, %arg5: memref<8x128xf32, #tpu.memory_space<vmem>>, %arg6: memref<8x128xf32, #tpu.memory_space<vmem>>, %arg7: memref<8x128xf32, #tpu.memory_space<vmem>>, %arg8: memref<8x128xi32, #tpu.memory_space<vmem>>) attributes {dimension_semantics = [#tpu.dimension_semantics<parallel>, #tpu.dimension_semantics<arbitrary>], iteration_bounds = array<i64: 1, 1>, scalar_prefetch = 0 : i64, scratch_operands = 4 : i64, tpu.core_type = #tpu.core_type<tc>, window_params = [{transform_indices = @transform_0, window_bounds = array<i64: 8, 128>}, {transform_indices = @transform_1, window_bounds = array<i64: 8, 1>}, {transform_indices = @transform_2, window_bounds = array<i64: 8, 1>}]} {
    %c0_i32 = arith.constant 0 : i32
    %0 = arith.cmpi eq, %arg1, %c0_i32 : i32
    %1 = arith.extui %0 : i1 to i32
    %c0_i32_0 = arith.constant 0 : i32
    %2 = arith.cmpi ne, %1, %c0_i32_0 : i32
    scf.if %2 {
      %cst = arith.constant -3.40282347E+38 : f32
      %12 = vector.broadcast %cst : f32 to vector<8x128xf32>
      %c0 = arith.constant 0 : index
      %c0_7 = arith.constant 0 : index
      %13 = vector.load %arg5[%c0, %c0_7] : memref<8x128xf32, #tpu.memory_space<vmem>>, vector<8x128xf32>
      tpu.vector_store %arg5[%c0, %c0_7], %12 {strides = array<i32>} : memref<8x128xf32, #tpu.memory_space<vmem>>, vector<8x128xf32>,
      %cst_8 = arith.constant 0.000000e+00 : f32
      %14 = vector.broadcast %cst_8 : f32 to vector<8x128xf32>
      %c0_9 = arith.constant 0 : index
      %c0_10 = arith.constant 0 : index
      %15 = vector.load %arg6[%c0_9, %c0_10] : memref<8x128xf32, #tpu.memory_space<vmem>>, vector<8x128xf32>
      tpu.vector_store %arg6[%c0_9, %c0_10], %14 {strides = array<i32>} : memref<8x128xf32, #tpu.memory_space<vmem>>, vector<8x128xf32>,
      %cst_11 = arith.constant 0.000000e+00 : f32
      %16 = vector.broadcast %cst_11 : f32 to vector<8x128xf32>
      %c0_12 = arith.constant 0 : index
      %c0_13 = arith.constant 0 : index
      %17 = vector.load %arg7[%c0_12, %c0_13] : memref<8x128xf32, #tpu.memory_space<vmem>>, vector<8x128xf32>
      tpu.vector_store %arg7[%c0_12, %c0_13], %16 {strides = array<i32>} : memref<8x128xf32, #tpu.memory_space<vmem>>, vector<8x128xf32>,
      %18 = tpu.iota {dimensions = array<i32: 1>} : vector<8x128xi32>
      %c0_14 = arith.constant 0 : index
      %c0_15 = arith.constant 0 : index
      %19 = vector.load %arg3[%c0_14, %c0_15] : memref<8x1xi32, #tpu.memory_space<vmem>>, vector<8x1xi32>
      %20 = vector.broadcast %19 : vector<8x1xi32> to vector<8x128xi32>
      %21 = arith.subi %20, %18 : vector<8x128xi32>
      %c0_16 = arith.constant 0 : index
      %c0_17 = arith.constant 0 : index
      %22 = vector.load %arg8[%c0_16, %c0_17] : memref<8x128xi32, #tpu.memory_space<vmem>>, vector<8x128xi32>
      tpu.vector_store %arg8[%c0_16, %c0_17], %21 {strides = array<i32>} : memref<8x128xi32, #tpu.memory_space<vmem>>, vector<8x128xi32>,
    } else {
    }
    %c0_i32_1 = arith.constant 0 : i32
    %3 = arith.cmpi ne, %arg1, %c0_i32_1 : i32
    %4 = arith.extui %3 : i1 to i32
    %c0_i32_2 = arith.constant 0 : i32
    %5 = arith.cmpi ne, %4, %c0_i32_2 : i32
    scf.if %5 {
      %c128_i32 = arith.constant 128 : i32
      %12 = arith.muli %arg1, %c128_i32 : i32
      %c0 = arith.constant 0 : index
      %c0_7 = arith.constant 0 : index
      %13 = vector.load %arg8[%c0, %c0_7] : memref<8x128xi32, #tpu.memory_space<vmem>>, vector<8x128xi32>
      %cst = arith.constant -3.40282347E+38 : f32
      %14 = vector.broadcast %cst : f32 to vector<8x128xf32>
      %cst_8 = arith.constant 0.000000e+00 : f32
      %15 = vector.broadcast %cst_8 : f32 to vector<8x128xf32>
      %c0_9 = arith.constant 0 : index
      %c0_10 = arith.constant 0 : index
      %16 = vector.load %arg2[%c0_9, %c0_10] : memref<8x128xf32, #tpu.memory_space<vmem>>, vector<8x128xf32>
      %17 = arith.maximumf %14, %16 : vector<8x128xf32>
      %c0_i32_11 = arith.constant 0 : i32
      %18 = arith.addi %12, %c0_i32_11 : i32
      %19 = vector.broadcast %18 : i32 to vector<8x128xi32>
      %20 = arith.cmpi eq, %13, %19 : vector<8x128xi32>
      %c0_i32_12 = arith.constant 0 : i32
      %21 = arith.sitofp %c0_i32_12 : i32 to f32
      %22 = vector.broadcast %21 : f32 to vector<8x128xf32>
      %23 = arith.select %20, %16, %22 : vector<8x128xi1>, vector<8x128xf32>
      %24 = arith.addf %15, %23 : vector<8x128xf32>
      %c0_13 = arith.constant 0 : index
      %c0_14 = arith.constant 0 : index
      %25 = vector.load %arg7[%c0_13, %c0_14] : memref<8x128xf32, #tpu.memory_space<vmem>>, vector<8x128xf32>
      %26 = arith.addf %25, %24 : vector<8x128xf32>
      %c0_15 = arith.constant 0 : index
      %c0_16 = arith.constant 0 : index
      %27 = vector.load %arg7[%c0_15, %c0_16] : memref<8x128xf32, #tpu.memory_space<vmem>>, vector<8x128xf32>
      tpu.vector_store %arg7[%c0_15, %c0_16], %26 {strides = array<i32>} : memref<8x128xf32, #tpu.memory_space<vmem>>, vector<8x128xf32>,
      %c0_17 = arith.constant 0 : index
      %c0_18 = arith.constant 0 : index
      %28 = vector.load %arg5[%c0_17, %c0_18] : memref<8x128xf32, #tpu.memory_space<vmem>>, vector<8x128xf32>
      %29 = arith.maximumf %28, %17 : vector<8x128xf32>
      %c0_19 = arith.constant 0 : index
      %c0_20 = arith.constant 0 : index
      %30 = vector.load %arg6[%c0_19, %c0_20] : memref<8x128xf32, #tpu.memory_space<vmem>>, vector<8x128xf32>
      %31 = arith.subf %28, %29 : vector<8x128xf32>
      %32 = math.exp %31 : vector<8x128xf32>
      %33 = arith.mulf %30, %32 : vector<8x128xf32>
      %c0_21 = arith.constant 0 : index
      %c0_22 = arith.constant 0 : index
      %34 = vector.load %arg2[%c0_21, %c0_22] : memref<8x128xf32, #tpu.memory_space<vmem>>, vector<8x128xf32>
      %35 = arith.subf %34, %29 : vector<8x128xf32>
      %36 = math.exp %35 : vector<8x128xf32>
      %37 = arith.addf %33, %36 : vector<8x128xf32>
      %c0_23 = arith.constant 0 : index
      %c0_24 = arith.constant 0 : index
      %38 = vector.load %arg6[%c0_23, %c0_24] : memref<8x128xf32, #tpu.memory_space<vmem>>, vector<8x128xf32>
      tpu.vector_store %arg6[%c0_23, %c0_24], %37 {strides = array<i32>} : memref<8x128xf32, #tpu.memory_space<vmem>>, vector<8x128xf32>,
      %c0_25 = arith.constant 0 : index
      %c0_26 = arith.constant 0 : index
      %39 = vector.load %arg5[%c0_25, %c0_26] : memref<8x128xf32, #tpu.memory_space<vmem>>, vector<8x128xf32>
      tpu.vector_store %arg5[%c0_25, %c0_26], %29 {strides = array<i32>} : memref<8x128xf32, #tpu.memory_space<vmem>>, vector<8x128xf32>,
    } else {
    }
    %c0_i32_3 = arith.constant 0 : i32
    %6 = arith.cmpi eq, %arg1, %c0_i32_3 : i32
    %7 = arith.extui %6 : i1 to i32
    %c0_i32_4 = arith.constant 0 : i32
    %8 = arith.cmpi ne, %7, %c0_i32_4 : i32
    scf.if %8 {
      %c128_i32 = arith.constant 128 : i32
      %12 = arith.muli %arg1, %c128_i32 : i32
      %c0 = arith.constant 0 : index
      %c0_7 = arith.constant 0 : index
      %13 = vector.load %arg8[%c0, %c0_7] : memref<8x128xi32, #tpu.memory_space<vmem>>, vector<8x128xi32>
      %14 = tpu.iota {dimensions = array<i32: 1>} : vector<8x128xi32>
      %cst = arith.constant -3.40282347E+38 : f32
      %15 = vector.broadcast %cst : f32 to vector<8x128xf32>
      %cst_8 = arith.constant 0.000000e+00 : f32
      %16 = vector.broadcast %cst_8 : f32 to vector<8x128xf32>
      %c0_9 = arith.constant 0 : index
      %c0_10 = arith.constant 0 : index
      %17 = vector.load %arg2[%c0_9, %c0_10] : memref<8x128xf32, #tpu.memory_space<vmem>>, vector<8x128xf32>
      %c32_i32 = arith.constant 32 : i32
      %18 = arith.subi %c32_i32, %12 : i32
      %c0_i32_11 = arith.constant 0 : i32
      %19 = arith.subi %18, %c0_i32_11 : i32
      %20 = vector.broadcast %19 : i32 to vector<8x128xi32>
      %21 = arith.cmpi slt, %14, %20 : vector<8x128xi32>
      %cst_12 = arith.constant -3.40282347E+38 : f32
      %22 = vector.broadcast %cst_12 : f32 to vector<8x128xf32>
      %23 = arith.select %21, %17, %22 : vector<8x128xi1>, vector<8x128xf32>
      %24 = arith.maximumf %15, %23 : vector<8x128xf32>
      %c0_i32_13 = arith.constant 0 : i32
      %25 = arith.addi %12, %c0_i32_13 : i32
      %26 = vector.broadcast %25 : i32 to vector<8x128xi32>
      %27 = arith.cmpi eq, %13, %26 : vector<8x128xi32>
      %c0_i32_14 = arith.constant 0 : i32
      %28 = arith.sitofp %c0_i32_14 : i32 to f32
      %29 = vector.broadcast %28 : f32 to vector<8x128xf32>
      %30 = arith.select %27, %23, %29 : vector<8x128xi1>, vector<8x128xf32>
      %31 = arith.addf %16, %30 : vector<8x128xf32>
      %c0_15 = arith.constant 0 : index
      %c0_16 = arith.constant 0 : index
      %32 = vector.load %arg7[%c0_15, %c0_16] : memref<8x128xf32, #tpu.memory_space<vmem>>, vector<8x128xf32>
      %33 = arith.addf %32, %31 : vector<8x128xf32>
      %c0_17 = arith.constant 0 : index
      %c0_18 = arith.constant 0 : index
      %34 = vector.load %arg7[%c0_17, %c0_18] : memref<8x128xf32, #tpu.memory_space<vmem>>, vector<8x128xf32>
      tpu.vector_store %arg7[%c0_17, %c0_18], %33 {strides = array<i32>} : memref<8x128xf32, #tpu.memory_space<vmem>>, vector<8x128xf32>,
      %c0_19 = arith.constant 0 : index
      %c0_20 = arith.constant 0 : index
      %35 = vector.load %arg5[%c0_19, %c0_20] : memref<8x128xf32, #tpu.memory_space<vmem>>, vector<8x128xf32>
      %36 = arith.maximumf %35, %24 : vector<8x128xf32>
      %c0_21 = arith.constant 0 : index
      %c0_22 = arith.constant 0 : index
      %37 = vector.load %arg6[%c0_21, %c0_22] : memref<8x128xf32, #tpu.memory_space<vmem>>, vector<8x128xf32>
      %38 = arith.subf %35, %36 : vector<8x128xf32>
      %39 = math.exp %38 : vector<8x128xf32>
      %40 = arith.mulf %37, %39 : vector<8x128xf32>
      %c0_23 = arith.constant 0 : index
      %c0_24 = arith.constant 0 : index
      %41 = vector.load %arg2[%c0_23, %c0_24] : memref<8x128xf32, #tpu.memory_space<vmem>>, vector<8x128xf32>
      %42 = arith.subf %41, %36 : vector<8x128xf32>
      %43 = math.exp %42 : vector<8x128xf32>
      %c32_i32_25 = arith.constant 32 : i32
      %44 = arith.subi %c32_i32_25, %12 : i32
      %c0_i32_26 = arith.constant 0 : i32
      %45 = arith.subi %44, %c0_i32_26 : i32
      %46 = vector.broadcast %45 : i32 to vector<8x128xi32>
      %47 = arith.cmpi slt, %14, %46 : vector<8x128xi32>
      %cst_27 = arith.constant 0.000000e+00 : f32
      %48 = vector.broadcast %cst_27 : f32 to vector<8x128xf32>
      %49 = arith.select %47, %43, %48 : vector<8x128xi1>, vector<8x128xf32>
      %50 = arith.addf %40, %49 : vector<8x128xf32>
      %c0_28 = arith.constant 0 : index
      %c0_29 = arith.constant 0 : index
      %51 = vector.load %arg6[%c0_28, %c0_29] : memref<8x128xf32, #tpu.memory_space<vmem>>, vector<8x128xf32>
      tpu.vector_store %arg6[%c0_28, %c0_29], %50 {strides = array<i32>} : memref<8x128xf32, #tpu.memory_space<vmem>>, vector<8x128xf32>,
      %c0_30 = arith.constant 0 : index
      %c0_31 = arith.constant 0 : index
      %52 = vector.load %arg5[%c0_30, %c0_31] : memref<8x128xf32, #tpu.memory_space<vmem>>, vector<8x128xf32>
      tpu.vector_store %arg5[%c0_30, %c0_31], %36 {strides = array<i32>} : memref<8x128xf32, #tpu.memory_space<vmem>>, vector<8x128xf32>,
    } else {
    }
    %c0_i32_5 = arith.constant 0 : i32
    %9 = arith.cmpi eq, %arg1, %c0_i32_5 : i32
    %10 = arith.extui %9 : i1 to i32
    %c0_i32_6 = arith.constant 0 : i32
    %11 = arith.cmpi ne, %10, %c0_i32_6 : i32
    scf.if %11 {
      %c0 = arith.constant 0 : index
      %c0_7 = arith.constant 0 : index
      %12 = vector.load %arg5[%c0, %c0_7] : memref<8x128xf32, #tpu.memory_space<vmem>>, vector<8x128xf32>
      %c0_8 = arith.constant 0 : index
      %c0_9 = arith.constant 0 : index
      %13 = vector.load %arg6[%c0_8, %c0_9] : memref<8x128xf32, #tpu.memory_space<vmem>>, vector<8x128xf32>
      %cst = arith.constant dense<0xFF800000> : vector<8xf32>
      %14 = vector.multi_reduction <maximumf>, %12, %cst [1] : vector<8x128xf32> to vector<8xf32>
      %15 = vector.shape_cast %14 : vector<8xf32> to vector<8x1xf32>
      %16 = vector.broadcast %15 : vector<8x1xf32> to vector<8x128xf32>
      %17 = arith.subf %12, %16 : vector<8x128xf32>
      %18 = math.exp %17 : vector<8x128xf32>
      %19 = arith.mulf %13, %18 : vector<8x128xf32>
      %cst_10 = arith.constant dense<0.000000e+00> : vector<8xf32>
      %20 = vector.multi_reduction <add>, %19, %cst_10 [1] : vector<8x128xf32> to vector<8xf32>
      %21 = vector.shape_cast %20 : vector<8xf32> to vector<8x1xf32>
      %22 = math.log %21 : vector<8x1xf32>
      %23 = arith.addf %15, %22 : vector<8x1xf32>
      %c0_11 = arith.constant 0 : index
      %c0_12 = arith.constant 0 : index
      %24 = vector.load %arg7[%c0_11, %c0_12] : memref<8x128xf32, #tpu.memory_space<vmem>>, vector<8x128xf32>
      %cst_13 = arith.constant dense<0.000000e+00> : vector<8xf32>
      %25 = vector.multi_reduction <add>, %24, %cst_13 [1] : vector<8x128xf32> to vector<8xf32>
      %26 = vector.shape_cast %25 : vector<8xf32> to vector<8x1xf32>
      %27 = arith.subf %23, %26 : vector<8x1xf32>
      %c0_14 = arith.constant 0 : index
      %c0_15 = arith.constant 0 : index
      %28 = vector.load %arg4[%c0_14, %c0_15] : memref<8x1xf32, #tpu.memory_space<vmem>>, vector<8x1xf32>
      tpu.vector_store %arg4[%c0_14, %c0_15], %27 {strides = array<i32>} : memref<8x1xf32, #tpu.memory_space<vmem>>, vector<8x1xf32>,
    } else {
    }
    return
  }
  func.func @transform_0(%arg0: i32, %arg1: i32) -> (i32, i32) {
    %c0_i32 = arith.constant 0 : i32
    return %arg0, %arg1 : i32, i32
  }
  func.func @transform_1(%arg0: i32, %arg1: i32) -> (i32, i32) {
    %c0_i32 = arith.constant 0 : i32
    %c0_i32_0 = arith.constant 0 : i32
    return %arg0, %c0_i32 : i32, i32
  }
  func.func @transform_2(%arg0: i32, %arg1: i32) -> (i32, i32) {
    %c0_i32 = arith.constant 0 : i32
    %c0_i32_0 = arith.constant 0 : i32
    return %arg0, %c0_i32 : i32, i32
  }
}

</mosaic_0001>

<bundles_post_ra>
// kernel: tpu_custom_call.1
= control target key start
LH: loop header
LB: loop body
LE: loop exit
PB: predicated region body
PF: predicated region fallthrough
CT: control target
= control target key end

     0   :  { %v18_v0 = vlaneseq  ;;  %v123_v1 = vmov 0   ;;  %vm107_vm2 = vcmask 7168   ;;  %s148_s0 = inlined_call_operand.vmem [shape: f32[8,32], index: 0, kind: input, shape index: {}]   ;;  %s149_s1 = inlined_call_operand.vmem [shape: s32[8,1], index: 1, kind: input, shape index: {}]   ;;  %s150_s2 = inlined_call_operand.vmem [shape: f32[8,1], index: 2, kind: output, shape index: {}]  }
   0x1   :  { %114 = vset.pattern.permute.xlu0 %v123_v1  ;;  %v62_v3 = vld [vmem:[%s148_s0] sm:$0xff] }
   0x2   :  { %v19_v2 = vand.u32 127, %v18_v0  ;;  %v20_v9 = vld [vmem:[%s149_s1] sm:$0xff] }
   0x4   :  { %vm65_vm0 = vcmp.lt.s32.totalorder %v19_v2, 32 }
   0x5   :  { %v66_v4 = vsel %vm65_vm0, %v62_v3, -3.4028235e+38 }
   0x6   :  { %v67_v5 = vmax.f32 %v66_v4, -3.4028235e+38 }
   0x8   :  { %v76_v6 = vmax.f32 %v67_v5, -3.4028235e+38 }
   0xa   :  { %92 = vmax.xlane.f32.xlu0 %v76_v6  ;;  %v83_v7 = vsub.f32 %v62_v3, %v76_v6  ;;  %v78_v12 = vsub.f32 -3.4028235e+38, %v76_v6 }
   0xc   :  { %v84_v8 = vmul.f32 1.442695, %v83_v7  ;;  %v79_v13 = vmul.f32 1.442695, %v78_v12 }
   0xe   :  { %115 = vpow2.f32 %v84_v8 }
   0xf   :  { %117 = vpow2.f32 %v79_v13 }
  0x18   :  { %v116_v10 = vpop.eup %115 }
  0x19   :  { %v86_v11 = vsel %vm65_vm0, %v116_v10, 0.0  ;;  %v118_v17 = vpop.eup %117 }
  0x1a   :  { %v81_v18 = vmul.f32 0.0, %v118_v17 }
  0x1c   :  { %v87_v20 = vadd.f32 %v86_v11, %v81_v18 }
  0x20   :  { %22 = vperm.xlu0 %114, %v20_v9  }
  0x97   :  { %v93_v14 = vpop.xlane.xlu0 %92 }
  0x98   :  { %v94_v15 = vsub.f32 %v76_v6, %v93_v14 }
  0x9a   :  { %v95_v16 = vmul.f32 1.442695, %v94_v15 }
  0x9c   :  { %119 = vpow2.f32 %v95_v16 }
  0x9f   :  { %v23_v19 = vpop.permute.xlu0 %22 }
  0xa0   :  { %v24_v21 = vsub.s32 %v23_v19, %v19_v2 }
  0xa2   :  { %vm69_vm1 = vcmp.eq.s32.totalorder %v24_v21, 0 }
  0xa3   :  { %v70_v24 = vsel %vm69_vm1, %v66_v4, 0.0 }
  0xa6   :  { %v120_v22 = vpop.eup %119 }
  0xa7   :  { %v97_v23 = vmul.f32 %v120_v22, %v87_v20 }
  0xa9   :  { %98 = vadd.xlane.f32.xlu1 %v97_v23 }
  0xad   :  { %104 = vadd.xlane.f32.xlu1 %v70_v24 }
 0x136   :  { %v99_v25 = vpop.xlane.xlu1 %98 }
 0x137   :  { %121 = vlog2.f32 %v99_v25 }
 0x13a   :  { %v105_v28 = vpop.xlane.xlu1 %104 }
 0x141   :  { %v122_v26 = vpop.eup %121 }
 0x142   :  { %v101_v27 = vmul.f32 0.6931472, %v122_v26 }
 0x144   :  { %v102_v29 = vadd.f32 %v101_v27, %v93_v14 }
 0x146   :  { %v106_v30 = vsub.f32 %v102_v29, %v105_v28 }
 0x148   :  { %108 = vst.msk [vmem:[%s150_s2] sm:$0xff] %vm107_vm2, %v106_v30 }

</bundles_post_ra>
